<compile_context>
chip_gen: v6e
topology: v6e:2x2x1
jax: 0.10.0
libtpu: 0.0.40
codegen_flags: <defaults>
</compile_context>

<pallas_src>
import functools

import jax
import jax.numpy as jnp
from jax.experimental import pallas as pl
from jax.experimental.pallas import tpu as pltpu


def _round_up(x, m):
    return (x + m - 1) // m * m


def _device_info():
    try:
        kind = jax.devices()[0].device_kind.lower()
    except Exception:
        kind = ""
    is_v7 = "v7" in kind
    return kind, is_v7, (2 if is_v7 else 1)


# ---------------------------------------------------------------------------
# Kernel
# ---------------------------------------------------------------------------
def _critic_mlp_kernel(*refs, n_layers, activation, clip_lo, clip_hi):
    # refs = (x, w0, b0, ..., w_{L-2}, b_{L-2}, w_head_row, b_head, o)
    x_ref = refs[0]
    o_ref = refs[-1]

    h = x_ref[...]                                    # (tile, d_in), native dtype
    for l in range(n_layers - 1):
        w = refs[1 + 2 * l][...]                      # (d_in_pad, d_out_pad) compute dtype
        b = refs[2 + 2 * l][...]                      # (1, d_out_pad) f32
        h = jnp.dot(h.astype(w.dtype), w,
                    preferred_element_type=jnp.float32) + b
        if activation == "Tanh":
            h = jnp.tanh(h)
        elif activation == "ELU":
            h = jnp.where(h > 0, h, jnp.exp(h) - 1.0)
        elif activation == "GELU":
            h = jax.nn.gelu(h)
        else:                                         # ReLU (default)
            h = jnp.maximum(h, 0.0)

    # Head (out_features == 1): VPU broadcast-multiply + lane reduction instead
    # of an N=1 MXU pass that would use 1/256 of the array.
    w_row = refs[2 * n_layers - 1][...]               # (1, d_hidden_pad) f32
    b_last = refs[2 * n_layers][...]                  # (1, 1) f32
    y = jnp.sum(h.astype(jnp.float32) * w_row, axis=-1, keepdims=True) + b_last
    y = jnp.clip(y, clip_lo, clip_hi)                 # (tile, 1) f32
    # Lane-dense store: batch tile on the lane axis -> unmasked vector stores.
    o_ref[...] = jnp.transpose(y).astype(o_ref.dtype)  # (1, tile)


# ---------------------------------------------------------------------------
# One-time parameter preparation
# ---------------------------------------------------------------------------
def prepare_params(params, compute_dtype=jnp.bfloat16):
    """Zero-pad hidden widths to multiples of 128 (mathematically exact) and cast
    hidden weights to the compute dtype (bf16 everywhere: the MXU takes bf16
    natively on v5e/v6e/v7x and accumulation stays f32).  Biases stay f32.
    The final Linear(out=1) weight is stored as an f32 row vector for the VPU head."""
    n_layers = len(params) // 2
    prepared = []
    prev_out_pad = None
    for l in range(n_layers):
        w = jnp.asarray(params[2 * l], jnp.float32)
        b = jnp.asarray(params[2 * l + 1], jnp.float32).reshape(1, -1)
        d_in, d_out = w.shape
        in_pad = d_in if prev_out_pad is None else prev_out_pad
        if l == n_layers - 1:
            assert d_out == 1, "CriticS head must have out_features == 1"
            w_row = jnp.zeros((1, in_pad), jnp.float32).at[0, :d_in].set(w[:, 0])
            prepared += [w_row, b]                    # (1, in_pad), (1, 1)
            prev_out_pad = 1
        else:
            out_pad = _round_up(d_out, 128)
            w_p = jnp.zeros((in_pad, out_pad), compute_dtype)
            w_p = w_p.at[:d_in, :d_out].set(w.astype(compute_dtype))
            b_p = jnp.zeros((1, out_pad), jnp.float32).at[:, :d_out].set(b)
            prepared += [w_p, b_p]
            prev_out_pad = out_pad
    return prepared


# ---------------------------------------------------------------------------
# Tiling / spec helpers
# ---------------------------------------------------------------------------
def _select_batch_tile(B, d_in, obs_itemsize, hidden_pads, compute_itemsize,
                       num_cores, work_budget_bytes, param_bytes):
    # Per-row VMEM working set: double-buffered obs block + compute-dtype cast of
    # obs + f32 hidden activations (with one temp each) + head temps + 2x f32 out.
    per_row = (2 * d_in * obs_itemsize
               + d_in * compute_itemsize
               + sum(hp * (8 + compute_itemsize) for hp in hidden_pads)
               + 16)
    avail = max(work_budget_bytes - 2 * param_bytes, 1 << 20)
    budget_rows = max(128, avail // max(per_row, 1))

    # DMA-granularity target: >= ~2 MiB of obs per grid step, never below 1024 rows.
    row_obs_bytes = max(1, d_in * obs_itemsize)
    target_rows = max(1024, pl.cdiv(2 << 20, row_obs_bytes))

    tile = min(target_rows, budget_rows, 32768)
    tile = max(128, (tile // 128) * 128)

    # v7x megacore: ensure the "parallel" batch axis has enough steps to feed
    # both TensorCores (>=4 for pipeline overlap) when the batch allows it.
    if num_cores > 1:
        if B >= 4 * 128:
            min_steps = 4
        elif B >= 2 * 128:
            min_steps = 2
        else:
            min_steps = 1
        if min_steps > 1:
            tile = min(tile, max(128, _round_up(pl.cdiv(B, min_steps), 128)))

    return min(tile, _round_up(max(B, 1), 128))


def _param_spec(shape, single_buffer):
    index_map = lambda i: (0, 0)   # constant block index -> DMA'd once, VMEM-resident
    if single_buffer:
        # Double-buffering a constant-index operand is pure VMEM waste; only
        # worth requesting when the parameter footprint is large.
        try:
            return pl.BlockSpec(shape, index_map, pipeline_mode=pl.Buffered(1))
        except (TypeError, AttributeError):
            pass
    return pl.BlockSpec(shape, index_map)


# ---------------------------------------------------------------------------
# Forward
# ---------------------------------------------------------------------------
def critic_s_forward(obs, prepared_params, clip_range, *,
                     activation="ReLU", batch_tile=None):
    """CriticS.forward: returns (B,) clamped critic values."""
    B, d_in = obs.shape
    n_layers = len(prepared_params) // 2
    assert n_layers >= 1

    hidden_ws = prepared_params[0:2 * (n_layers - 1):2]
    hidden_pads = [int(w.shape[1]) for w in hidden_ws]
    compute_itemsize = hidden_ws[0].dtype.itemsize if hidden_ws else 4
    param_bytes = sum(int(p.size) * p.dtype.itemsize for p in prepared_params)

    _, is_v7, num_cores = _device_info()
    if is_v7:
        vmem_limit, work_budget = 48 << 20, 24 << 20   # 64 MiB physical per TC
    else:
        vmem_limit, work_budget = 64 << 20, 40 << 20   # 128 MiB physical (v5e/v6e)

    if batch_tile is None:
        tile = _select_batch_tile(B, d_in, obs.dtype.itemsize, hidden_pads,
                                  compute_itemsize, num_cores, work_budget,
                                  param_bytes)
    else:
        tile = max(128, _round_up(int(batch_tile), 128))

    n_blocks = pl.cdiv(B, tile)
    if n_blocks == 1:
        tile = B                      # single full-extent block: no padding needed
        out_cols = B
    else:
        out_cols = n_blocks * tile    # pad output columns only (tiny, sliced off)

    grid = (n_blocks,)
    single_buffer_params = param_bytes > (4 << 20)

    in_specs = [pl.BlockSpec((tile, d_in), lambda i: (i, 0))]   # obs, native dtype
    for p in prepared_params:
        in_specs.append(_param_spec(p.shape, single_buffer_params))

    out_specs = pl.BlockSpec((1, tile), lambda i: (0, i))       # lane-dense output
    out_shape = jax.ShapeDtypeStruct((1, out_cols), jnp.float32)

    flops = 0
    for w in hidden_ws:
        flops += 2 * B * int(w.shape[0]) * int(w.shape[1])
    flops += 2 * B * int(prepared_params[2 * (n_layers - 1)].shape[1])   # head
    transcendentals = B * sum(hidden_pads) if activation == "Tanh" else 0
    bytes_accessed = (int(obs.size) * obs.dtype.itemsize + param_bytes + B * 4)

    kernel = functools.partial(_critic_mlp_kernel,
                               n_layers=n_layers,
                               activation=activation,
                               clip_lo=float(clip_range[0]),
                               clip_hi=float(clip_range[1]))

    out = pl.pallas_call(
        kernel,
        grid=grid,
        in_specs=in_specs,
        out_specs=out_specs,
        out_shape=out_shape,
        compiler_params=pltpu.CompilerParams(
            dimension_semantics=("parallel",),       # v7x: shard batch over 2 TCs
            vmem_limit_bytes=int(vmem_limit)),
        cost_estimate=pl.CostEstimate(flops=int(flops),
                                      transcendentals=int(transcendentals),
                                      bytes_accessed=int(bytes_accessed)),
    )(obs, *prepared_params)

    return out[0, :B]                 # glue: torch.squeeze(x, dim=-1)


# ---------------------------------------------------------------------------
# Synthetic parameters (nn.Linear-shaped) and self-test
# ---------------------------------------------------------------------------
def init_params(key, obs_dim, hidden_shape):
    dims = [obs_dim] + list(hidden_shape) + [1]
    params = []
    for i in range(len(dims) - 1):
        key, kw, kb = jax.random.split(key, 3)
        scale = 1.0 / jnp.sqrt(jnp.float32(dims[i]))
        w = jax.random.uniform(kw, (dims[i], dims[i + 1]), jnp.float32, -scale, scale)
        b = jax.random.uniform(kb, (dims[i + 1],), jnp.float32, -scale, scale)
        params += [w, b]
    return params


if __name__ == "__main__":
    B, OBS_DIM = 8, 24
    HIDDEN = [64, 64]
    CLIP_RANGE = (-10.0, 10.0)
    ACTIVATION = "ReLU"

    key = jax.random.PRNGKey(0)
    k_obs, k_par, k_obs2 = jax.random.split(key, 3)
    raw_params = init_params(k_par, OBS_DIM, HIDDEN)
    prepared = prepare_params(raw_params)            # bf16 hidden weights, f32 head

    def reference(o):
        # Matched-precision plain-JAX reference (bf16 inputs to hidden matmuls,
        # f32 accumulation, exact f32 head).
        h = o
        nl = len(raw_params) // 2
        for l in range(nl - 1):
            w = raw_params[2 * l].astype(jnp.bfloat16)
            b = raw_params[2 * l + 1]
            h = jnp.dot(h.astype(jnp.bfloat16), w,
                        preferred_element_type=jnp.float32) + b
            h = jnp.maximum(h, 0.0) if ACTIVATION == "ReLU" else jnp.tanh(h)
        y = h @ raw_params[-2] + raw_params[-1]
        return jnp.clip(y[:, 0], CLIP_RANGE[0], CLIP_RANGE[1])

    # 1) Small batch: single full-extent block, no padding anywhere.
    obs = jax.random.normal(k_obs, (B, OBS_DIM), jnp.float32)
    out = critic_s_forward(obs, prepared, CLIP_RANGE, activation=ACTIVATION)
    jax.block_until_ready(out)
    assert out.shape == (B,)
    assert jnp.allclose(out, reference(obs), atol=2e-3, rtol=2e-3), (out, reference(obs))

    # 2) Larger, non-tile-divisible batch: exercises the multi-step "parallel"
    #    grid and the partial last obs block (no wrapper-side obs copy/pad).
    B2 = 1000
    obs2 = jax.random.normal(k_obs2, (B2, OBS_DIM), jnp.float32)
    out2 = critic_s_forward(obs2, prepared, CLIP_RANGE,
                            activation=ACTIVATION, batch_tile=128)
    jax.block_until_ready(out2)
    assert out2.shape == (B2,)
    assert jnp.allclose(out2, reference(obs2), atol=2e-3, rtol=2e-3)

    # TODO(synk): getLoss (MSE) and initialize() are training-side utilities, not
    # part of the forward pass, so they are left to plain JAX at the call site.
    print("KERNEL_OK")
</pallas_src>

<mosaic_0001>
module attributes {stable_mosaic.version = 11 : i64} {
  func.func @_critic_mlp_kernel(%arg0: i32, %arg1: memref<8x24xf32, #tpu.memory_space<vmem>>, %arg2: memref<24x128xbf16, #tpu.memory_space<vmem>>, %arg3: memref<1x128xf32, #tpu.memory_space<vmem>>, %arg4: memref<128x128xbf16, #tpu.memory_space<vmem>>, %arg5: memref<1x128xf32, #tpu.memory_space<vmem>>, %arg6: memref<1x128xf32, #tpu.memory_space<vmem>>, %arg7: memref<1x1xf32, #tpu.memory_space<vmem>>, %arg8: memref<1x8xf32, #tpu.memory_space<vmem>>) attributes {dimension_semantics = [#tpu.dimension_semantics<parallel>], iteration_bounds = array<i64: 1>, scalar_prefetch = 0 : i64, scratch_operands = 0 : i64, tpu.core_type = #tpu.core_type<tc>, window_params = [{transform_indices = @transform_0, window_bounds = array<i64: 8, 24>}, {pipeline_mode = #tpu.pipeline_mode<synchronous>, transform_indices = @transform_1, window_bounds = array<i64: 24, 128>}, {pipeline_mode = #tpu.pipeline_mode<synchronous>, transform_indices = @transform_2, window_bounds = array<i64: 1, 128>}, {pipeline_mode = #tpu.pipeline_mode<synchronous>, transform_indices = @transform_3, window_bounds = array<i64: 128, 128>}, {pipeline_mode = #tpu.pipeline_mode<synchronous>, transform_indices = @transform_4, window_bounds = array<i64: 1, 128>}, {pipeline_mode = #tpu.pipeline_mode<synchronous>, transform_indices = @transform_5, window_bounds = array<i64: 1, 128>}, {pipeline_mode = #tpu.pipeline_mode<synchronous>, transform_indices = @transform_6, window_bounds = array<i64: 1, 1>}, {transform_indices = @transform_7, window_bounds = array<i64: 1, 8>}]} {
    %c0 = arith.constant 0 : index
    %c0_0 = arith.constant 0 : index
    %0 = vector.load %arg1[%c0, %c0_0] : memref<8x24xf32, #tpu.memory_space<vmem>>, vector<8x24xf32>
    %c0_1 = arith.constant 0 : index
    %c0_2 = arith.constant 0 : index
    %1 = vector.load %arg2[%c0_1, %c0_2] : memref<24x128xbf16, #tpu.memory_space<vmem>>, vector<24x128xbf16>
    %c0_3 = arith.constant 0 : index
    %c0_4 = arith.constant 0 : index
    %2 = vector.load %arg3[%c0_3, %c0_4] : memref<1x128xf32, #tpu.memory_space<vmem>>, vector<1x128xf32>
    %3 = arith.truncf %0 : vector<8x24xf32> to vector<8x24xbf16>
    %cst = arith.constant dense<0.000000e+00> : vector<8x128xf32>
    %4 = tpu.matmul %3, %1, %cst {dimension_numbers = #tpu.dot_dimension_numbers<[1], [0], [0], [1], [0, 0, 1, 1], [], []>} : vector<8x24xbf16>, vector<24x128xbf16>, vector<8x128xf32> -> vector<8x128xf32>
    %5 = vector.broadcast %2 : vector<1x128xf32> to vector<8x128xf32>
    %6 = arith.addf %4, %5 : vector<8x128xf32>
    %cst_5 = arith.constant 0.000000e+00 : f32
    %7 = vector.broadcast %cst_5 : f32 to vector<8x128xf32>
    %8 = arith.maximumf %6, %7 : vector<8x128xf32>
    %c0_6 = arith.constant 0 : index
    %c0_7 = arith.constant 0 : index
    %9 = vector.load %arg4[%c0_6, %c0_7] : memref<128x128xbf16, #tpu.memory_space<vmem>>, vector<128x128xbf16>
    %c0_8 = arith.constant 0 : index
    %c0_9 = arith.constant 0 : index
    %10 = vector.load %arg5[%c0_8, %c0_9] : memref<1x128xf32, #tpu.memory_space<vmem>>, vector<1x128xf32>
    %11 = arith.truncf %8 : vector<8x128xf32> to vector<8x128xbf16>
    %cst_10 = arith.constant dense<0.000000e+00> : vector<8x128xf32>
    %12 = tpu.matmul %11, %9, %cst_10 {dimension_numbers = #tpu.dot_dimension_numbers<[1], [0], [0], [1], [0, 0, 1, 1], [], []>} : vector<8x128xbf16>, vector<128x128xbf16>, vector<8x128xf32> -> vector<8x128xf32>
    %13 = vector.broadcast %10 : vector<1x128xf32> to vector<8x128xf32>
    %14 = arith.addf %12, %13 : vector<8x128xf32>
    %cst_11 = arith.constant 0.000000e+00 : f32
    %15 = vector.broadcast %cst_11 : f32 to vector<8x128xf32>
    %16 = arith.maximumf %14, %15 : vector<8x128xf32>
    %c0_12 = arith.constant 0 : index
    %c0_13 = arith.constant 0 : index
    %17 = vector.load %arg6[%c0_12, %c0_13] : memref<1x128xf32, #tpu.memory_space<vmem>>, vector<1x128xf32>
    %c0_14 = arith.constant 0 : index
    %c0_15 = arith.constant 0 : index
    %18 = vector.load %arg7[%c0_14, %c0_15] : memref<1x1xf32, #tpu.memory_space<vmem>>, vector<1x1xf32>
    %19 = vector.broadcast %17 : vector<1x128xf32> to vector<8x128xf32>
    %20 = arith.mulf %16, %19 : vector<8x128xf32>
    %cst_16 = arith.constant dense<0.000000e+00> : vector<8xf32>
    %21 = vector.multi_reduction <add>, %20, %cst_16 [1] : vector<8x128xf32> to vector<8xf32>
    %22 = vector.shape_cast %21 : vector<8xf32> to vector<8x1xf32>
    %23 = vector.broadcast %18 : vector<1x1xf32> to vector<8x1xf32>
    %24 = arith.addf %22, %23 : vector<8x1xf32>
    %cst_17 = arith.constant -1.000000e+01 : f32
    %cst_18 = arith.constant 1.000000e+01 : f32
    %25 = vector.broadcast %cst_17 : f32 to vector<8x1xf32>
    %26 = arith.maximumf %25, %24 : vector<8x1xf32>
    %27 = vector.broadcast %cst_18 : f32 to vector<8x1xf32>
    %28 = arith.minimumf %27, %26 : vector<8x1xf32>
    %29 = tpu.transpose %28, [1, 0] : vector<8x1xf32> -> vector<1x8xf32>
    %c0_19 = arith.constant 0 : index
    %c0_20 = arith.constant 0 : index
    %30 = vector.load %arg8[%c0_19, %c0_20] : memref<1x8xf32, #tpu.memory_space<vmem>>, vector<1x8xf32>
    tpu.vector_store %arg8[%c0_19, %c0_20], %29 {strides = array<i32>} : memref<1x8xf32, #tpu.memory_space<vmem>>, vector<1x8xf32>,
    return
  }
  func.func @transform_0(%arg0: i32) -> (i32, i32) {
    %c0_i32 = arith.constant 0 : i32
    %c0_i32_0 = arith.constant 0 : i32
    return %arg0, %c0_i32 : i32, i32
  }
  func.func @transform_1(%arg0: i32) -> (i32, i32) {
    %c0_i32 = arith.constant 0 : i32
    %c0_i32_0 = arith.constant 0 : i32
    %c0_i32_1 = arith.constant 0 : i32
    return %c0_i32, %c0_i32_0 : i32, i32
  }
  func.func @transform_2(%arg0: i32) -> (i32, i32) {
    %c0_i32 = arith.constant 0 : i32
    %c0_i32_0 = arith.constant 0 : i32
    %c0_i32_1 = arith.constant 0 : i32
    return %c0_i32, %c0_i32_0 : i32, i32
  }
  func.func @transform_3(%arg0: i32) -> (i32, i32) {
    %c0_i32 = arith.constant 0 : i32
    %c0_i32_0 = arith.constant 0 : i32
    %c0_i32_1 = arith.constant 0 : i32
    return %c0_i32, %c0_i32_0 : i32, i32
  }
  func.func @transform_4(%arg0: i32) -> (i32, i32) {
    %c0_i32 = arith.constant 0 : i32
    %c0_i32_0 = arith.constant 0 : i32
    %c0_i32_1 = arith.constant 0 : i32
    return %c0_i32, %c0_i32_0 : i32, i32
  }
  func.func @transform_5(%arg0: i32) -> (i32, i32) {
    %c0_i32 = arith.constant 0 : i32
    %c0_i32_0 = arith.constant 0 : i32
    %c0_i32_1 = arith.constant 0 : i32
    return %c0_i32, %c0_i32_0 : i32, i32
  }
  func.func @transform_6(%arg0: i32) -> (i32, i32) {
    %c0_i32 = arith.constant 0 : i32
    %c0_i32_0 = arith.constant 0 : i32
    %c0_i32_1 = arith.constant 0 : i32
    return %c0_i32, %c0_i32_0 : i32, i32
  }
  func.func @transform_7(%arg0: i32) -> (i32, i32) {
    %c0_i32 = arith.constant 0 : i32
    %c0_i32_0 = arith.constant 0 : i32
    return %c0_i32, %arg0 : i32, i32
  }
}

</mosaic_0001>

<bundles_post_ra>
// kernel: tpu_custom_call.1
= control target key start
LH: loop header
LB: loop body
LE: loop exit
PB: predicated region body
PF: predicated region fallthrough
CT: control target
= control target key end

     0   :  { %s554_s0 = inlined_call_operand.hbm [shape: f32[8,24], index: 0, kind: input, shape index: {}]   ;;  %s555_s1 = inlined_call_operand.hbm [shape: bf16[24,128], index: 1, kind: input, shape index: {}]   ;;  %s556_s2 = inlined_call_operand.vmem [shape: f32[1,128], index: 2, kind: input, shape index: {}]   ;;  %s557_s3 = inlined_call_operand.hbm [shape: bf16[128,128], index: 3, kind: input, shape index: {}]   ;;  %s558_s4 = inlined_call_operand.vmem [shape: f32[1,128], index: 4, kind: input, shape index: {}]   ;;  %s559_s5 = inlined_call_operand.vmem [shape: f32[1,128], index: 5, kind: input, shape index: {}]   ;;  %s560_s6 = inlined_call_operand.<no memory space> [shape: f32[1,1], index: 6, kind: input, shape index: {}]   ;;  %s561_s7 = inlined_call_operand.hbm [shape: f32[1,8], index: 7, kind: output, shape index: {}]  }
   0x1   :  { %v12_v0 = vstv %s560_s6 }
   0x2   :  { %13 = vst [vmem:[#allocation2] sm:$0x1] %v12_v0 }
   0x3   :  { %14 = vsyncpa [#allocation4], 0 }
   0x4   :  { %15 = vsyncpa [#allocation7], 0 }
   0x5   :  { %16 = vsyncpa [#allocation5], 0  ;;  %s482_s26 = smov [#allocation6]  }
   0x6   :  { %s32_s27 = sshll.u32 %s482_s26, 4  ;;  %s33_s27 = int_to_ptr.vmem [resolvable:$true] %s32_s27 }
   0x7   :  { %s404_s28 = scalar_lea.vmem %s33_s27, 192  ;;  %p409_p1 = scmp.lt.s32.totalorder %s33_s27, %s33_s27 }
   0x8   :  { %p405_p0 = scmp.ne.s32.totalorder %s33_s27, %s404_s28  ;;  %p410_p2 = scmp.lt.s32.totalorder %s404_s28, %s404_s28 }
   0xa   :  { %p411_p3 = por %p410_p2, %p409_p1 }
   0xc   :  { %p412_p4 = pnand %p411_p3, %p405_p0 }
   0xe   :  { %415 = shalt.err (!%p412_p4)
}
   0xf   :  { %s483_s29 = smov 64   ;;  %s484_s30 = smov 4  }
  0x10   :  { %38 = dma.hbm_to_vmem [thread:$0]  %s555_s1, 192, %s33_s27, [#allocation7], %s483_s29, %s483_s29, %s484_s30  }
  0x11   :  { %s485_s6 = smov [#allocation3]   ;;  %s486_s11 = smov [#allocation8]  }
  0x12   :  { %s23_s10 = sshll.u32 %s485_s6, 4  ;;  %s46_s12 = sshll.u32 %s486_s11, 4  ;;  %s24_s10 = int_to_ptr.vmem [resolvable:$true] %s23_s10  ;;  %s47_s12 = int_to_ptr.vmem [resolvable:$true] %s46_s12 }
  0x13   :  { %s424_s13 = scalar_lea.vmem %s24_s10, 128  ;;  %p429_p6 = scmp.lt.s32.totalorder %s24_s10, %s24_s10 }
  0x14   :  { %p425_p5 = scmp.ne.s32.totalorder %s24_s10, %s424_s13  ;;  %p430_p7 = scmp.lt.s32.totalorder %s424_s13, %s424_s13 }
  0x16   :  { %p431_p8 = por %p430_p7, %p429_p6 }
  0x18   :  { %p432_p9 = pnand %p431_p8, %p425_p5 }
  0x1a   :  { %435 = shalt.err (!%p432_p9)
}
  0x1b   :  { %26 = dma.hbm_to_vmem [thread:$0]  %s554_s0, 128, %s24_s10, [#allocation4]  }
  0x1c   :  { %s444_s16 = scalar_lea.vmem %s47_s12, 1024  ;;  %p449_p11 = scmp.lt.s32.totalorder %s47_s12, %s47_s12 }
  0x1d   :  { %p445_p10 = scmp.ne.s32.totalorder %s47_s12, %s444_s16  ;;  %p450_p12 = scmp.lt.s32.totalorder %s444_s16, %s444_s16 }
  0x1f   :  { %p451_p13 = por %p450_p12, %p449_p11 }
  0x21   :  { %p452_p0 = pnand %p451_p13, %p445_p10 }
  0x23   :  { %455 = shalt.err (!%p452_p0)
}
  0x24   :  { %52 = dma.hbm_to_vmem [thread:$0]  %s557_s3, 1024, %s47_s12, [#allocation7], %s483_s29, %s483_s29, %s484_s30  }
  0x25   :  { %476 = dma.done.wait [#allocation4], 128  }
  0x26   :  { %477 = vsyncadd [#allocation4], 4294967168 }
  0x27   :  { %478 = dma.done.wait [#allocation7], 1216  }
  0x28   :  { %479 = vsyncadd [#allocation7], 4294966080  ;;  %v487_v1 = vmov 0.0   ;;  %vm488_vm0 = vmmov 0   ;;  %vm94_vm1 = vcmask 1043456   ;;  %v387_v3 = vld [vmem:[#allocation6] sm:$0xff]  }
  0x29   :  { %350 = vmatprep.subr.bf16.mxu0 %v487_v1  ;;  %354 = vmatprep.mubr.msk.bf16.mxu0 %vm488_vm0, %v487_v1  ;;  %v386_v2 = vld [vmem:[#allocation6 + $0x8] ss:$0 sps:$4 sm:$0xff]   ;;  %v69_v6 = vld [vmem:[#allocation3] sm:$0xff]  ;;  %vm90_vm2 = vcmask 195584   ;;  %v391_v10 = vld [vmem:[#allocation8 + $0x20] sm:$0xff]   ;;  %vm304_vm3 = vcmask 57344  }
  0x2a   :  { %358 = vmatprep.subr.bf16.mxu1 %v487_v1  ;;  %374 = vmatprep.mubr.msk.bf16.mxu1 %vm488_vm0, %v487_v1  ;;  %v96_v4 = vsel %vm94_vm1, %v386_v2, 0  ;;  %v388_v5 = vld [vmem:[#allocation8 + $0x38] sm:$0xff]   ;;  %v389_v7 = vld [vmem:[#allocation8 + $0x30] sm:$0xff]   ;;  %v74_v8 = vpack.c.bf16 %v69_v6, %v69_v6  ;;  %v390_v9 = vld [vmem:[#allocation8 + $0x28] sm:$0xff]  }
  0x2b   :  { %351 = vmatpush3.bf16.msra.mxu0 %v96_v4  ;;  %359 = vmatpush3.bf16.msra.mxu1 %v388_v5  ;;  %v392_v11 = vld [vmem:[#allocation8 + $0x18] sm:$0xff]   ;;  %v393_v12 = vld [vmem:[#allocation8 + $0x10] sm:$0xff]   ;;  %v394_v13 = vld [vmem:[#allocation8 + $0x8] sm:$0xff]  }
  0x2c   :  { %352 = vmatprep.subr.bf16.mxu0 %v487_v1  ;;  %360 = vmatprep.subr.bf16.mxu1 %v487_v1  ;;  %v395_v14 = vld [vmem:[#allocation8] sm:$0xff]   ;;  %v322_v15 = vld [vmem:[%s556_s2] ss:$0 sm:$0xff]  ;;  %s489_s2 = smov [#allocation9]  }
  0x2d   :  { %v326_v23 = vld [vmem:[%s558_s4] ss:$0 sm:$0xff]  ;;  %s312_s22 = sshll.u32 %s489_s2, 4  ;;  %s313_s22 = int_to_ptr.vmem [resolvable:$true] %s312_s22 }
  0x2e   :  { %v335_v27 = vld [vmem:[%s559_s5] ss:$0 sm:$0xff]  ;;  %s456_s4 = scalar_lea.vmem %s313_s22, 16  ;;  %s460_s23 = scalar_lea.vmem %s313_s22, 32 }
  0x2f   :  { %353 = vmatpush3.bf16.msra.mxu0 %v387_v3  ;;  %361 = vmatpush3.bf16.msra.mxu1 %v389_v7  ;;  %v336_v32 = vld [vmem:[#allocation2] ss:$0 sm:$0xff]  ;;  %p457_p1 = scmp.ne.s32.totalorder %s313_s22, %s456_s4  ;;  %p461_p2 = scmp.lt.s32.totalorder %s313_s22, %s313_s22 }
  0x30   :  { %362 = vmatprep.subr.bf16.mxu1 %v487_v1  ;;  %p462_p3 = scmp.lt.s32.totalorder %s460_s23, %s456_s4 }
  0x32   :  { %355 = vmatmul.mubr.msk.bf16.vlgmr.msra.gmra.mxu0 %vm90_vm2, %v74_v8  ;;  %p463_p4 = por %p462_p3, %p461_p2 }
  0x33   :  { %363 = vmatpush3.bf16.msra.mxu1 %v390_v9 }
  0x34   :  { %364 = vmatprep.subr.bf16.mxu1 %v487_v1  ;;  %p464_p5 = pnand %p463_p4, %p457_p1 }
  0x37   :  { %365 = vmatpush3.bf16.msra.mxu1 %v391_v10 }
  0x38   :  { %366 = vmatprep.subr.bf16.mxu1 %v487_v1 }
  0x3b   :  { %367 = vmatpush3.bf16.msra.mxu1 %v392_v11 }
  0x3c   :  { %368 = vmatprep.subr.bf16.mxu1 %v487_v1 }
  0x3f   :  { %369 = vmatpush3.bf16.msra.mxu1 %v393_v12 }
  0x40   :  { %370 = vmatprep.subr.bf16.mxu1 %v487_v1 }
  0x43   :  { %371 = vmatpush3.bf16.msra.mxu1 %v394_v13 }
  0x44   :  { %372 = vmatprep.subr.bf16.mxu1 %v487_v1 }
  0x47   :  { %373 = vmatpush3.bf16.msra.mxu1 %v395_v14 }
  0xf2   :  { %v132_v16 = vpop.f32.mrf.mxu0 }
  0xf3   :  { %v133_v17 = vadd.f32 %v322_v15, %v132_v16 }
  0xf4   :  { %v356_v18 = vpop.f32.mrf.mxu0 }
  0xf5   :  { %v138_v19 = vmax.f32 %v133_v17, 0.0 }
  0xf6   :  { %v135_v20 = vpop.f32.mrf.mxu0 }
  0xf7   :  { %v156_v21 = vpack.c.bf16 %v138_v19, %v138_v19 }
  0xf8   :  { %v357_v22 = vpop.f32.mrf.mxu0 }
  0xf9   :  { %375 = vmatmul.mubr.bf16.vlgmr.msra.gmra.mxu1 %v156_v21 }
 0x1b9   :  { %v245_v24 = vpop.f32.mrf.mxu1 }
 0x1ba   :  { %v246_v25 = vadd.f32 %v326_v23, %v245_v24 }
 0x1bb   :  { %v376_v26 = vpop.f32.mrf.mxu1 }
 0x1bc   :  { %v251_v28 = vmax.f32 %v246_v25, 0.0 }
 0x1bd   :  { %v248_v29 = vpop.f32.mrf.mxu1 }
 0x1be   :  { %v260_v30 = vmul.f32 %v335_v27, %v251_v28 }
 0x1bf   :  { %v377_v31 = vpop.f32.mrf.mxu1 }
 0x1c0   :  { %261 = vadd.xlane.f32.xlu0 %v260_v30 }
 0x249   :  { %v262_v33 = vpop.xlane.xlu0 %261 }
 0x24a   :  { %v269_v34 = vadd.f32 %v336_v32, %v262_v33 }
 0x24c   :  { %v337_v35 = vclamps-f32 %v269_v34, 10.0 }
 0x24e   :  { %272 = vxpose.xlu0.b32.start.end [1/1] (short) (narrow) %v337_v35, 8 }
 0x2ca   :  { %v288_v36 = vpop.trf.xlu0 }
 0x2cb   :  { %305 = vst.msk [vmem:[#allocation9] sm:$0x1] %vm304_vm3, %v288_v36 }
 0x2cc   :  { %467 = shalt.err (!%p464_p5)
}
 0x2cd   :  { %315 = dma.vmem_to_hbm [thread:$0]  %s313_s22, 16, %s561_s7, [#allocation5]  }
 0x2ce   :  { %480 = dma.done.wait [#allocation5], 16  }
 0x2cf   :  { %481 = vsyncadd [#allocation5], 4294967280 }
 0x2d0   :  { %319 = vsyncpa [#allocation4], 1 }
 0x2d1   :  { %320 = vsyncpa [#allocation7], 1 }
 0x2d2   :  { %321 = vsyncpa [#allocation5], 1 }

</bundles_post_ra>
